<compile_context>
chip_gen: v6e
topology: v6e:2x2x1
jax: 0.10.0
libtpu: 0.0.40
codegen_flags: <defaults>
</compile_context>

<pallas_src>
import math

import jax
import jax.numpy as jnp
from jax.experimental import pallas as pl
from jax.experimental.pallas import tpu as pltpu

_LANE = 128
_SUBLANE = 8


def _round_up(a, m):
    return (a + m - 1) // m * m


# ----------------------------------------------------------------------------
# Pallas kernel: one batch tile of  mean = x @ W_pad + b_pad  on the MXU.
# W_pad / b_pad are lane-padded (last dim multiple of 128) and VMEM-resident
# across all grid steps (constant index_map).
# ----------------------------------------------------------------------------
def _diag_gaussian_mean_kernel(x_ref, w_ref, b_ref, mean_ref):
    acc = jnp.dot(x_ref[...], w_ref[...], preferred_element_type=jnp.float32)
    mean_ref[...] = (acc + b_ref[...]).astype(mean_ref.dtype)


def diag_gaussian_mean(x, w_pad, b_pad, num_outputs, *, tm=256):
    """Batch-tiled fused linear. Returns mean of shape (batch, num_outputs)."""
    batch, num_inputs = x.shape
    n_pad = w_pad.shape[1]

    # Batch tile: multiple of the 8-sublane minimum, capped at `tm`.
    tm_eff = min(tm, _round_up(batch, _SUBLANE))
    batch_p = _round_up(batch, tm_eff)
    if batch_p != batch:
        x = jnp.pad(x, ((0, batch_p - batch), (0, 0)))

    grid = (batch_p // tm_eff,)

    mean_p = pl.pallas_call(
        _diag_gaussian_mean_kernel,
        out_shape=jax.ShapeDtypeStruct((batch_p, n_pad), x.dtype),
        grid_spec=pl.GridSpec(
            grid=grid,
            in_specs=[
                # x: tiled over batch, full feature dim.
                pl.BlockSpec((tm_eff, num_inputs), lambda i: (i, 0)),
                # W, b: full arrays, VMEM-resident across the grid.
                pl.BlockSpec((num_inputs, n_pad), lambda i: (0, 0)),
                pl.BlockSpec((1, n_pad), lambda i: (0, 0)),
            ],
            out_specs=pl.BlockSpec((tm_eff, n_pad), lambda i: (i, 0)),
        ),
        compiler_params=pltpu.CompilerParams(
            dimension_semantics=("parallel",),
            vmem_limit_bytes=32 * 1024 * 1024,
        ),
    )(x, w_pad, b_pad)

    return mean_p[:batch, :num_outputs]


# ----------------------------------------------------------------------------
# Thin distribution wrapper mirroring FixedNormal (glue, plain JAX).
# ----------------------------------------------------------------------------
class FixedNormal:
    def __init__(self, mean, std):
        self.mean = mean
        self.std = std

    def mode(self):
        return self.mean

    def log_probs(self, actions):
        var = self.std ** 2
        lp = -((actions - self.mean) ** 2) / (2.0 * var) \
             - jnp.log(self.std) - 0.5 * math.log(2.0 * math.pi)
        return lp.sum(-1, keepdims=True)

    def entropy(self):
        ent = 0.5 + 0.5 * math.log(2.0 * math.pi) + jnp.log(self.std)
        return ent.sum(-1)


class DiagGaussian:
    """Pallas-backed DiagGaussian head (mean = orthogonal-init Linear, logstd = 0)."""

    def __init__(self, num_inputs, num_outputs, key):
        self.num_inputs = num_inputs
        self.num_outputs = num_outputs

        # Orthogonal init for fc_mean.weight (deterministic), bias = 0,
        # logstd = 0 (matching nn.init.orthogonal_ / constant_(0) / zeros).
        a = jax.random.normal(key, (num_inputs, num_outputs), dtype=jnp.float32)
        q, r = jnp.linalg.qr(a)
        q = q * jnp.sign(jnp.diag(r))
        self.w = q.astype(jnp.float32)                    # (K, N)
        self.b = jnp.zeros((num_outputs,), jnp.float32)
        self.logstd = jnp.zeros((num_outputs,), jnp.float32)

        # Lane-dense padded copies used by the kernel (padded once at init;
        # zero columns contribute nothing to the matmul).
        n_pad = _round_up(num_outputs, _LANE)
        self.w_pad = jnp.pad(self.w, ((0, 0), (0, n_pad - num_outputs)))
        self.b_pad = jnp.pad(self.b, (0, n_pad - num_outputs)).reshape(1, n_pad)

    def __call__(self, x):
        mean = diag_gaussian_mean(x, self.w_pad, self.b_pad, self.num_outputs)
        # std is identical across the batch -> compute once, broadcast lazily
        # (no kernel writeback of a batch-broadcast constant).
        std = jnp.broadcast_to(jnp.exp(self.logstd), mean.shape)
        return FixedNormal(mean, std)


if __name__ == "__main__":
    key = jax.random.PRNGKey(0)
    k_param, k_x = jax.random.split(key)

    batch, num_inputs, num_outputs = 8, 32, 16
    head = DiagGaussian(num_inputs, num_outputs, k_param)
    x = jax.random.normal(k_x, (batch, num_inputs), dtype=jnp.float32)

    dist = head(x)
    jax.block_until_ready(dist.mean)
    jax.block_until_ready(dist.std)

    # Reference check (plain JAX)
    ref_mean = x @ head.w + head.b
    ref_std = jnp.broadcast_to(jnp.exp(head.logstd), ref_mean.shape)
    assert dist.mean.shape == (batch, num_outputs)
    assert dist.std.shape == (batch, num_outputs)
    assert jnp.allclose(dist.mean, ref_mean, atol=1e-5, rtol=1e-5)
    assert jnp.allclose(dist.std, ref_std, atol=1e-6, rtol=1e-6)
    assert dist.mode().shape == (batch, num_outputs)
    assert dist.log_probs(ref_mean).shape == (batch, 1)
    assert dist.entropy().shape == (batch,)

    print("KERNEL_OK")
</pallas_src>

<mosaic_0001>
module attributes {stable_mosaic.version = 11 : i64} {
  func.func @_diag_gaussian_mean_kernel(%arg0: i32, %arg1: memref<8x32xf32, #tpu.memory_space<vmem>>, %arg2: memref<32x128xf32, #tpu.memory_space<vmem>>, %arg3: memref<1x128xf32, #tpu.memory_space<vmem>>, %arg4: memref<8x128xf32, #tpu.memory_space<vmem>>) attributes {dimension_semantics = [#tpu.dimension_semantics<parallel>], iteration_bounds = array<i64: 1>, scalar_prefetch = 0 : i64, scratch_operands = 0 : i64, tpu.core_type = #tpu.core_type<tc>, window_params = [{transform_indices = @transform_0, window_bounds = array<i64: 8, 32>}, {pipeline_mode = #tpu.pipeline_mode<synchronous>, transform_indices = @transform_1, window_bounds = array<i64: 32, 128>}, {pipeline_mode = #tpu.pipeline_mode<synchronous>, transform_indices = @transform_2, window_bounds = array<i64: 1, 128>}, {transform_indices = @transform_3, window_bounds = array<i64: 8, 128>}]} {
    %c0 = arith.constant 0 : index
    %c0_0 = arith.constant 0 : index
    %0 = vector.load %arg1[%c0, %c0_0] : memref<8x32xf32, #tpu.memory_space<vmem>>, vector<8x32xf32>
    %c0_1 = arith.constant 0 : index
    %c0_2 = arith.constant 0 : index
    %1 = vector.load %arg2[%c0_1, %c0_2] : memref<32x128xf32, #tpu.memory_space<vmem>>, vector<32x128xf32>
    %cst = arith.constant dense<0.000000e+00> : vector<8x128xf32>
    %2 = tpu.matmul %0, %1, %cst {dimension_numbers = #tpu.dot_dimension_numbers<[1], [0], [0], [1], [0, 0, 1, 1], [], []>} : vector<8x32xf32>, vector<32x128xf32>, vector<8x128xf32> -> vector<8x128xf32>
    %c0_3 = arith.constant 0 : index
    %c0_4 = arith.constant 0 : index
    %3 = vector.load %arg3[%c0_3, %c0_4] : memref<1x128xf32, #tpu.memory_space<vmem>>, vector<1x128xf32>
    %4 = vector.broadcast %3 : vector<1x128xf32> to vector<8x128xf32>
    %5 = arith.addf %2, %4 : vector<8x128xf32>
    %c0_5 = arith.constant 0 : index
    %c0_6 = arith.constant 0 : index
    %6 = vector.load %arg4[%c0_5, %c0_6] : memref<8x128xf32, #tpu.memory_space<vmem>>, vector<8x128xf32>
    tpu.vector_store %arg4[%c0_5, %c0_6], %5 {strides = array<i32>} : memref<8x128xf32, #tpu.memory_space<vmem>>, vector<8x128xf32>,
    return
  }
  func.func @transform_0(%arg0: i32) -> (i32, i32) {
    %c0_i32 = arith.constant 0 : i32
    %c0_i32_0 = arith.constant 0 : i32
    return %arg0, %c0_i32 : i32, i32
  }
  func.func @transform_1(%arg0: i32) -> (i32, i32) {
    %c0_i32 = arith.constant 0 : i32
    %c0_i32_0 = arith.constant 0 : i32
    %c0_i32_1 = arith.constant 0 : i32
    return %c0_i32, %c0_i32_0 : i32, i32
  }
  func.func @transform_2(%arg0: i32) -> (i32, i32) {
    %c0_i32 = arith.constant 0 : i32
    %c0_i32_0 = arith.constant 0 : i32
    %c0_i32_1 = arith.constant 0 : i32
    return %c0_i32, %c0_i32_0 : i32, i32
  }
  func.func @transform_3(%arg0: i32) -> (i32, i32) {
    %c0_i32 = arith.constant 0 : i32
    %c0_i32_0 = arith.constant 0 : i32
    return %arg0, %c0_i32 : i32, i32
  }
}

</mosaic_0001>

<bundles_post_ra>
// kernel: tpu_custom_call.1
= control target key start
LH: loop header
LB: loop body
LE: loop exit
PB: predicated region body
PF: predicated region fallthrough
CT: control target
= control target key end

     0   :  { %8 = vsyncpa [#allocation3], 0  ;;  %s274_s0 = inlined_call_operand.hbm [shape: f32[8,32], index: 0, kind: input, shape index: {}]   ;;  %s275_s1 = inlined_call_operand.hbm [shape: f32[32,128], index: 1, kind: input, shape index: {}]   ;;  %s276_s2 = inlined_call_operand.vmem [shape: f32[1,128], index: 2, kind: input, shape index: {}]   ;;  %s277_s3 = inlined_call_operand.hbm [shape: f32[8,128], index: 3, kind: output, shape index: {}]  }
   0x1   :  { %9 = vsyncpa [#allocation6], 0 }
   0x2   :  { %10 = vsyncpa [#allocation4], 0  ;;  %s235_s12 = smov [#allocation2]   ;;  %s236_s14 = smov [#allocation5]  }
   0x3   :  { %s17_s13 = sshll.u32 %s235_s12, 4  ;;  %s26_s15 = sshll.u32 %s236_s14, 4  ;;  %s18_s13 = int_to_ptr.vmem [resolvable:$true] %s17_s13  ;;  %s27_s15 = int_to_ptr.vmem [resolvable:$true] %s26_s15 }
   0x4   :  { %s177_s16 = scalar_lea.vmem %s18_s13, 128  ;;  %p182_p1 = scmp.lt.s32.totalorder %s18_s13, %s18_s13 }
   0x5   :  { %p178_p0 = scmp.ne.s32.totalorder %s18_s13, %s177_s16  ;;  %p183_p2 = scmp.lt.s32.totalorder %s177_s16, %s177_s16 }
   0x7   :  { %p184_p3 = por %p183_p2, %p182_p1 }
   0x9   :  { %p185_p4 = pnand %p184_p3, %p178_p0 }
   0xb   :  { %188 = shalt.err (!%p185_p4)
}
   0xc   :  { %20 = dma.hbm_to_vmem [thread:$0]  %s274_s0, 128, %s18_s13, [#allocation3]  }
   0xd   :  { %s197_s19 = scalar_lea.vmem %s27_s15, 512  ;;  %p202_p6 = scmp.lt.s32.totalorder %s27_s15, %s27_s15 }
   0xe   :  { %p198_p5 = scmp.ne.s32.totalorder %s27_s15, %s197_s19  ;;  %p203_p7 = scmp.lt.s32.totalorder %s197_s19, %s197_s19 }
  0x10   :  { %p204_p8 = por %p203_p7, %p202_p6 }
  0x12   :  { %p205_p9 = pnand %p204_p8, %p198_p5 }
  0x14   :  { %208 = shalt.err (!%p205_p9)
}
  0x15   :  { %s237_s20 = smov 128   ;;  %s238_s21 = smov 8  }
  0x16   :  { %32 = dma.hbm_to_vmem [thread:$0]  %s275_s1, 512, %s27_s15, [#allocation6], %s237_s20, %s237_s20, %s238_s21  }
  0x17   :  { %229 = dma.done.wait [#allocation3], 128  }
  0x18   :  { %230 = vsyncadd [#allocation3], 4294967168 }
  0x19   :  { %231 = dma.done.wait [#allocation6], 512  }
  0x1a   :  { %232 = vsyncadd [#allocation6], 4294966784  ;;  %v239_v0 = vmov 0.0   ;;  %vm240_vm0 = vmmov 0   ;;  %v45_v1 = vld [vmem:[#allocation5 + $0x18] sm:$0xff]  ;;  %v44_v2 = vld [vmem:[#allocation5 + $0x10] sm:$0xff] }
  0x1b   :  { %151 = vmatprep.subr.mxu0 %v239_v0  ;;  %159 = vmatprep.mubr.msk.f32.mxu0 %vm240_vm0, %v239_v0  ;;  %v43_v3 = vld [vmem:[#allocation5 + $0x8] sm:$0xff]  ;;  %v42_v4 = vld [vmem:[#allocation5] sm:$0xff]  ;;  %v41_v5 = vld [vmem:[#allocation2] sm:$0xff]  ;;  %vm53_vm1 = vcmask 261120   ;;  %s241_s24 = smov [#allocation7]  }
  0x1c   :  { %152 = vmatpush3.msra.mxu0 %v45_v1  ;;  %v144_v6 = vld [vmem:[%s276_s2] ss:$0 sm:$0xff]  ;;  %s134_s25 = sshll.u32 %s241_s24, 4  ;;  %s135_s25 = int_to_ptr.vmem [resolvable:$true] %s134_s25 }
  0x1d   :  { %153 = vmatprep.subr.mxu0 %v239_v0  ;;  %s209_s26 = scalar_lea.vmem %s135_s25, 128  ;;  %p214_p11 = scmp.lt.s32.totalorder %s135_s25, %s135_s25 }
  0x1e   :  { %154 = vmatpush3.msra.mxu0 %v44_v2  ;;  %p210_p10 = scmp.ne.s32.totalorder %s135_s25, %s209_s26  ;;  %p215_p12 = scmp.lt.s32.totalorder %s209_s26, %s209_s26 }
  0x1f   :  { %155 = vmatprep.subr.mxu0 %v239_v0 }
  0x20   :  { %156 = vmatpush3.msra.mxu0 %v43_v3  ;;  %p216_p13 = por %p215_p12, %p214_p11 }
  0x21   :  { %157 = vmatprep.subr.mxu0 %v239_v0 }
  0x22   :  { %158 = vmatpush3.msra.mxu0 %v42_v4  ;;  %p217_p0 = pnand %p216_p13, %p210_p10 }
  0x23   :  { %160 = vmatmul.mubr.msk.f32.vlgmr.msra.gmra.mxu0 %vm53_vm1, %v41_v5 }
  0xe3   :  { %v123_v7 = vpop.f32.mrf.mxu0 }
  0xe4   :  { %v124_v8 = vadd.f32 %v144_v6, %v123_v7 }
  0xe5   :  { %v161_v9 = vpop.f32.mrf.mxu0 }
  0xe6   :  { %127 = vst [vmem:[#allocation7] sm:$0xff] %v124_v8 }
  0xe7   :  { %220 = shalt.err (!%p217_p0)
}
  0xe8   :  { %137 = dma.vmem_to_hbm [thread:$0]  %s135_s25, 128, %s277_s3, [#allocation4]  }
  0xe9   :  { %233 = dma.done.wait [#allocation4], 128  }
  0xea   :  { %234 = vsyncadd [#allocation4], 4294967168 }
  0xeb   :  { %141 = vsyncpa [#allocation3], 1 }
  0xec   :  { %142 = vsyncpa [#allocation6], 1 }
  0xed   :  { %143 = vsyncpa [#allocation4], 1 }

</bundles_post_ra>
